<compile_context>
chip_gen: v7x
topology: tpu7x:2x2x1
jax: 0.10.0
libtpu: 0.0.40
codegen_flags: <defaults>
</compile_context>

<pallas_src>
import functools
import math

import numpy as np

import jax
import jax.numpy as jnp
from jax.experimental import pallas as pl
from jax.experimental.pallas import tpu as pltpu


# ----------------------------------------------------------------------------
# Interpolation matrices (host-side numpy, memoized)
# ----------------------------------------------------------------------------

def _bilinear_matrix(out_size: int, in_size: int, align_corners: bool) -> np.ndarray:
    """1-D bilinear interpolation matrix (PyTorch semantics)."""
    j = np.arange(out_size, dtype=np.float64)
    if align_corners:
        if out_size > 1:
            real = j * ((in_size - 1) / (out_size - 1))
        else:
            real = np.zeros_like(j)
    else:
        real = (j + 0.5) * (in_size / out_size) - 0.5
        real = np.maximum(real, 0.0)                      # torch clamps negatives
    i0 = np.minimum(np.floor(real).astype(np.int64), in_size - 1)
    i1 = np.minimum(i0 + 1, in_size - 1)
    lam = real - i0
    m = np.zeros((out_size, in_size), dtype=np.float64)
    rows = np.arange(out_size)
    np.add.at(m, (rows, i0), 1.0 - lam)
    np.add.at(m, (rows, i1), lam)
    return m.astype(np.float32)


def _nearest_matrix(out_size: int, in_size: int) -> np.ndarray:
    """1-D nearest-neighbour matrix (PyTorch 'nearest' semantics)."""
    j = np.arange(out_size)
    src = np.minimum((j * in_size) // out_size, in_size - 1)
    m = np.zeros((out_size, in_size), dtype=np.float32)
    m[np.arange(out_size), src] = 1.0
    return m


_WEIGHT_CACHE = {}


def _get_weights(h, w, ho, wo, mode, align_corners, x_dtype):
    """Fused kron(A, B)^T weights, cached per configuration."""
    key = (h, w, ho, wo, mode, bool(align_corners), jnp.dtype(x_dtype).name)
    cached = _WEIGHT_CACHE.get(key)
    if cached is not None:
        return cached
    if mode == 'nearest':
        A, B = _nearest_matrix(ho, h), _nearest_matrix(wo, w)
    else:
        A = _bilinear_matrix(ho, h, align_corners)
        B = _bilinear_matrix(wo, w, align_corners)
    # Build directly in the transposed layout the kernel consumes:
    #   wk_t[hi*W + wi, oh*Wo + ow] = A[oh, hi] * B[ow, wi]
    wk_t = (A.T[:, None, :, None] * B.T[None, :, None, :]).reshape(h * w, ho * wo)

    wk_bf16 = jnp.asarray(wk_t, dtype=jnp.bfloat16)
    exact_in_bf16 = bool(jnp.all(wk_bf16.astype(jnp.float32) == jnp.asarray(wk_t)))
    if exact_in_bf16 or jnp.dtype(x_dtype) == jnp.dtype(jnp.bfloat16):
        wk = wk_bf16          # half the resident VMEM, single-pass MXU
    else:
        wk = jnp.asarray(wk_t, dtype=jnp.float32)   # non-dyadic weights + f32 input
    _WEIGHT_CACHE[key] = wk
    return wk


# ----------------------------------------------------------------------------
# VMEM budget / tile choice
# ----------------------------------------------------------------------------

def _cdiv(a: int, b: int) -> int:
    return -(-a // b)


def _round_up(a: int, m: int) -> int:
    return _cdiv(a, m) * m


@functools.lru_cache(maxsize=None)
def _vmem_budget_bytes() -> int:
    """Per-generation scoped-VMEM budget for this kernel."""
    try:
        cap = int(pltpu.get_tpu_info().vmem_capacity_bytes)
    except Exception:
        cap = 64 * 1024 * 1024                 # conservative (v7x-sized) default
    # ~48 MiB on 128 MiB parts (v5e/v6e), ~40 MiB on 64 MiB parts (v7x).
    return min(cap * 5 // 8, 48 * 1024 * 1024)


def _choose_block_planes(num_planes, in_cols, out_cols, itemsize,
                         weight_bytes, budget):
    """Planes per grid step.

    Constraints: multiple of 8 (sublane) or the full plane count, and the
    double-buffered input+output blocks plus the single-buffered resident
    weight must fit the budget.  Prefers >=4 (and even) grid steps so the
    large output writeback pipelines and both v7x TensorCores stay busy.
    """
    per_plane = 2 * (in_cols + out_cols) * itemsize        # double-buffered in + out
    avail = budget - weight_bytes - 2 * 1024 * 1024        # slack for runtime scratch
    cap = max(8, (avail // per_plane) // 8 * 8)
    if num_planes < 16:
        return num_planes                                   # single full block
    target_steps = 4 if num_planes >= 32 else 2
    tc = min(_round_up(_cdiv(num_planes, target_steps), 8), cap)
    steps = _cdiv(num_planes, tc)
    if steps > 1 and steps % 2:                             # prefer an even step count
        alt = tc - 8
        if alt >= 8 and _cdiv(num_planes, alt) % 2 == 0:
            tc = alt
    return max(tc, 8)


# ----------------------------------------------------------------------------
# Pallas kernel + jitted hot path
# ----------------------------------------------------------------------------

def _interp_kernel(w_ref, x_ref, o_ref):
    # w_ref: (Hi*Wi, Ho*Wo) resident fused interpolation weights (single-buffered)
    # x_ref: (TC, Hi*Wi)    lane-dense block of flattened input planes
    # o_ref: (TC, Ho*Wo)    lane-dense block of flattened output planes
    x = x_ref[...]
    if x.dtype != w_ref.dtype:
        x = x.astype(w_ref.dtype)          # bf16 operands -> single-pass MXU
    o_ref[...] = jnp.dot(
        x, w_ref[...], preferred_element_type=jnp.float32
    ).astype(o_ref.dtype)


@functools.partial(
    jax.jit,
    static_argnames=("out_hw", "tc", "single_buffer_weight", "vmem_limit"))
def _kron_interp(x, wk, *, out_hw, tc, single_buffer_weight, vmem_limit):
    n, c, h, w = x.shape
    ho, wo = out_hw
    p, k, n_out = n * c, h * w, ho * wo
    x_flat = x.reshape(p, k)

    if single_buffer_weight:
        w_spec = pl.BlockSpec((k, n_out), lambda i: (0, 0),
                              pipeline_mode=pl.Buffered(1))
    else:
        w_spec = pl.BlockSpec((k, n_out), lambda i: (0, 0))

    itemsize = jnp.dtype(x.dtype).itemsize
    cost = pl.CostEstimate(
        flops=2 * p * k * n_out,
        transcendentals=0,
        bytes_accessed=(p * k * itemsize + p * n_out * itemsize
                        + k * n_out * jnp.dtype(wk.dtype).itemsize),
    )

    out_flat = pl.pallas_call(
        _interp_kernel,
        out_shape=jax.ShapeDtypeStruct((p, n_out), x.dtype),
        grid_spec=pltpu.PrefetchScalarGridSpec(
            num_scalar_prefetch=0,
            grid=(pl.cdiv(p, tc),),
            in_specs=[
                w_spec,                                     # resident weights
                pl.BlockSpec((tc, k), lambda i: (i, 0)),    # input planes (lane-dense)
            ],
            out_specs=pl.BlockSpec((tc, n_out), lambda i: (i, 0)),
        ),
        compiler_params=pltpu.CompilerParams(
            dimension_semantics=("parallel",),
            vmem_limit_bytes=int(vmem_limit),
        ),
        cost_estimate=cost,
    )(wk, x_flat)

    return out_flat.reshape(n, c, ho, wo)


# ----------------------------------------------------------------------------
# Wrapper
# ----------------------------------------------------------------------------

def _resolve_size(h, w, size, scale_factor):
    if size is not None:
        if isinstance(size, (tuple, list)):
            assert len(size) == 2, "size must be (Ho, Wo) for 4-D input"
            return int(size[0]), int(size[1])
        return int(size), int(size)
    assert scale_factor is not None, "need size= or scale_factor="
    if isinstance(scale_factor, (tuple, list)):
        sh, sw = float(scale_factor[0]), float(scale_factor[1])
    else:
        sh = sw = float(scale_factor)
    return int(math.floor(h * sh)), int(math.floor(w * sw))


def _separable_jax(x, h, w, ho, wo, mode, align_corners):
    """Fallback for planes whose fused-kron weight would not fit VMEM."""
    # TODO(synk): dedicated separable two-pass Pallas kernel for large planes.
    if mode == 'nearest':
        A, B = _nearest_matrix(ho, h), _nearest_matrix(wo, w)
    else:
        A = _bilinear_matrix(ho, h, align_corners)
        B = _bilinear_matrix(wo, w, align_corners)
    out = jnp.einsum('oh,nchw,pw->ncop', jnp.asarray(A),
                     x.astype(jnp.float32), jnp.asarray(B))
    return out.astype(x.dtype)


def interpolate2d(x, size=None, scale_factor=None, mode='bilinear',
                  align_corners=False):
    """Equivalent of F.interpolate for 4-D NCHW input (bilinear / nearest)."""
    assert x.ndim == 4, "expected NCHW input"
    N, C, H, W = map(int, x.shape)
    align_corners = bool(align_corners)
    Ho, Wo = _resolve_size(H, W, size, scale_factor)

    wk = _get_weights(H, W, Ho, Wo, mode, align_corners, x.dtype)
    budget = _vmem_budget_bytes()
    weight_bytes = int(wk.size) * jnp.dtype(wk.dtype).itemsize
    itemsize = jnp.dtype(x.dtype).itemsize
    min_io_bytes = 8 * 2 * (H * W + Ho * Wo) * itemsize    # smallest legal tile, 2-buffered

    # Quartic weight growth guard: fall back before the budget goes negative.
    if (weight_bytes > budget // 4
            or weight_bytes + min_io_bytes + 2 * 1024 * 1024 > budget):
        return _separable_jax(x, H, W, Ho, Wo, mode, align_corners)

    tc = _choose_block_planes(N * C, H * W, Ho * Wo, itemsize,
                              weight_bytes, budget)
    kwargs = dict(out_hw=(Ho, Wo), tc=tc, vmem_limit=budget)
    try:
        return _kron_interp(x, wk, single_buffer_weight=True, **kwargs)
    except Exception:
        # Runtime does not accept Buffered(1) on a constant block: fall back to
        # the default (double-buffered) pipelining for the weight.
        return _kron_interp(x, wk, single_buffer_weight=False, **kwargs)


class InterpolateModule:
    """Pallas counterpart of the PyTorch wrapper module.

    Stores the F.interpolate arguments; 4-D NCHW bilinear / nearest
    interpolation (size= or scale_factor=) is implemented.
    """

    def __init__(self, *args, **kwdargs):
        # F.interpolate(input, size=None, scale_factor=None, mode='nearest',
        #               align_corners=None, ...)
        names = ('size', 'scale_factor', 'mode', 'align_corners')
        cfg = dict(zip(names, args))
        cfg.update(kwdargs)
        self.size = cfg.get('size')
        self.scale_factor = cfg.get('scale_factor')
        self.mode = cfg.get('mode', 'nearest')
        self.align_corners = bool(cfg.get('align_corners') or False)
        assert self.mode in ('bilinear', 'nearest'), \
            "only mode='bilinear' or 'nearest' is implemented"

    def __call__(self, x):
        return interpolate2d(x, size=self.size, scale_factor=self.scale_factor,
                             mode=self.mode, align_corners=self.align_corners)


# ----------------------------------------------------------------------------
# Self-test
# ----------------------------------------------------------------------------

def _reference(x, scale_factor):
    """High-precision float32 reference (separable bilinear, align_corners=False)."""
    N, C, H, W = x.shape
    s = int(scale_factor)
    A = jnp.asarray(_bilinear_matrix(H * s, H, False))
    B = jnp.asarray(_bilinear_matrix(W * s, W, False))
    return jnp.einsum('oh,nchw,pw->ncop', A, x.astype(jnp.float32), B,
                      precision='highest')


if __name__ == "__main__":
    key = jax.random.PRNGKey(0)
    x = jax.random.normal(key, (2, 4, 16, 16), dtype=jnp.float32)

    module = InterpolateModule(scale_factor=2, mode='bilinear', align_corners=False)

    out = jax.block_until_ready(module(x))
    assert out.shape == (2, 4, 32, 32), out.shape
    assert out.dtype == x.dtype

    ref = _reference(x, 2)
    # Deliberately loose tolerance: the kernel computes with bf16 MXU operands
    # (scale_factor=2 weights are exact in bf16; error is bf16 activation
    # rounding only, ~0.4% relative).
    err = float(jnp.max(jnp.abs(out - ref)))
    assert err < 3e-2, err

    # bf16 activation path (half the HBM bytes).
    xb = x.astype(jnp.bfloat16)
    outb = jax.block_until_ready(module(xb))
    assert outb.shape == (2, 4, 32, 32)
    assert outb.dtype == jnp.bfloat16
    errb = float(jnp.max(jnp.abs(outb.astype(jnp.float32) - ref)))
    assert errb < 5e-2, errb

    print("KERNEL_OK")
</pallas_src>

<mosaic_0001>
module attributes {stable_mosaic.version = 11 : i64} {
  func.func @_interp_kernel(%arg0: i32, %arg1: memref<256x1024xbf16, #tpu.memory_space<vmem>>, %arg2: memref<8x256xf32, #tpu.memory_space<vmem>>, %arg3: memref<8x1024xf32, #tpu.memory_space<vmem>>) attributes {dimension_semantics = [#tpu.dimension_semantics<parallel>], iteration_bounds = array<i64: 1>, scalar_prefetch = 0 : i64, scratch_operands = 0 : i64, tpu.core_type = #tpu.core_type<tc>, window_params = [{pipeline_mode = #tpu.pipeline_mode<synchronous>, transform_indices = @transform_0, window_bounds = array<i64: 256, 1024>}, {transform_indices = @transform_1, window_bounds = array<i64: 8, 256>}, {transform_indices = @transform_2, window_bounds = array<i64: 8, 1024>}]} {
    %c0 = arith.constant 0 : index
    %c0_0 = arith.constant 0 : index
    %0 = vector.load %arg2[%c0, %c0_0] : memref<8x256xf32, #tpu.memory_space<vmem>>, vector<8x256xf32>
    %1 = arith.truncf %0 : vector<8x256xf32> to vector<8x256xbf16>
    %c0_1 = arith.constant 0 : index
    %c0_2 = arith.constant 0 : index
    %2 = vector.load %arg1[%c0_1, %c0_2] : memref<256x1024xbf16, #tpu.memory_space<vmem>>, vector<256x1024xbf16>
    %cst = arith.constant dense<0.000000e+00> : vector<8x1024xf32>
    %3 = tpu.matmul %1, %2, %cst {dimension_numbers = #tpu.dot_dimension_numbers<[1], [0], [0], [1], [0, 0, 1, 1], [], []>} : vector<8x256xbf16>, vector<256x1024xbf16>, vector<8x1024xf32> -> vector<8x1024xf32>
    %c0_3 = arith.constant 0 : index
    %c0_4 = arith.constant 0 : index
    %4 = vector.load %arg3[%c0_3, %c0_4] : memref<8x1024xf32, #tpu.memory_space<vmem>>, vector<8x1024xf32>
    tpu.vector_store %arg3[%c0_3, %c0_4], %3 {strides = array<i32>} : memref<8x1024xf32, #tpu.memory_space<vmem>>, vector<8x1024xf32>,
    return
  }
  func.func @transform_0(%arg0: i32) -> (i32, i32) {
    %c0_i32 = arith.constant 0 : i32
    %c0_i32_0 = arith.constant 0 : i32
    %c0_i32_1 = arith.constant 0 : i32
    return %c0_i32, %c0_i32_0 : i32, i32
  }
  func.func @transform_1(%arg0: i32) -> (i32, i32) {
    %c0_i32 = arith.constant 0 : i32
    %c0_i32_0 = arith.constant 0 : i32
    return %arg0, %c0_i32 : i32, i32
  }
  func.func @transform_2(%arg0: i32) -> (i32, i32) {
    %c0_i32 = arith.constant 0 : i32
    %c0_i32_0 = arith.constant 0 : i32
    return %arg0, %c0_i32 : i32, i32
  }
}

module attributes {stable_mosaic.version = 11 : i64} {
  func.func @_interp_kernel(%arg0: i32, %arg1: memref<256x1024xbf16, #tpu.memory_space<vmem>>, %arg2: memref<8x256xf32, #tpu.memory_space<vmem>>, %arg3: memref<8x1024xf32, #tpu.memory_space<vmem>>) attributes {dimension_semantics = [#tpu.dimension_semantics<parallel>], iteration_bounds = array<i64: 1>, scalar_prefetch = 0 : i64, scratch_operands = 0 : i64, tpu.core_type = #tpu.core_type<tc>, window_params = [{pipeline_mode = #tpu.pipeline_mode<synchronous>, transform_indices = @transform_0, window_bounds = array<i64: 256, 1024>}, {transform_indices = @transform_1, window_bounds = array<i64: 8, 256>}, {transform_indices = @transform_2, window_bounds = array<i64: 8, 1024>}]} {
    %c0 = arith.constant 0 : index
    %c0_0 = arith.constant 0 : index
    %0 = vector.load %arg2[%c0, %c0_0] : memref<8x256xf32, #tpu.memory_space<vmem>>, vector<8x256xf32>
    %1 = arith.truncf %0 : vector<8x256xf32> to vector<8x256xbf16>
    %c0_1 = arith.constant 0 : index
    %c0_2 = arith.constant 0 : index
    %2 = vector.load %arg1[%c0_1, %c0_2] : memref<256x1024xbf16, #tpu.memory_space<vmem>>, vector<256x1024xbf16>
    %cst = arith.constant dense<0.000000e+00> : vector<8x1024xf32>
    %3 = tpu.matmul %1, %2, %cst {dimension_numbers = #tpu.dot_dimension_numbers<[1], [0], [0], [1], [0, 0, 1, 1], [], []>} : vector<8x256xbf16>, vector<256x1024xbf16>, vector<8x1024xf32> -> vector<8x1024xf32>
    %c0_3 = arith.constant 0 : index
    %c0_4 = arith.constant 0 : index
    %4 = vector.load %arg3[%c0_3, %c0_4] : memref<8x1024xf32, #tpu.memory_space<vmem>>, vector<8x1024xf32>
    tpu.vector_store %arg3[%c0_3, %c0_4], %3 {strides = array<i32>} : memref<8x1024xf32, #tpu.memory_space<vmem>>, vector<8x1024xf32>,
    return
  }
  func.func @transform_0(%arg0: i32) -> (i32, i32) {
    %c0_i32 = arith.constant 0 : i32
    %c0_i32_0 = arith.constant 0 : i32
    %c0_i32_1 = arith.constant 0 : i32
    return %c0_i32, %c0_i32_0 : i32, i32
  }
  func.func @transform_1(%arg0: i32) -> (i32, i32) {
    %c0_i32 = arith.constant 0 : i32
    %c0_i32_0 = arith.constant 0 : i32
    return %arg0, %c0_i32 : i32, i32
  }
  func.func @transform_2(%arg0: i32) -> (i32, i32) {
    %c0_i32 = arith.constant 0 : i32
    %c0_i32_0 = arith.constant 0 : i32
    return %arg0, %c0_i32 : i32, i32
  }
}

</mosaic_0001>

<bundles_post_ra>
// kernel: _kron_interp.1
= control target key start
LH: loop header
LB: loop body
LE: loop exit
PB: predicated region body
PF: predicated region fallthrough
CT: control target
= control target key end

     0   :  { %7 = vsyncpa [#allocation3], 0  ;;  %s1129_s9 = smov [#allocation2]   ;;  %s1201_s0 = inlined_call_operand.hbm [shape: bf16[256,1024], index: 0, kind: input, shape index: {}]   ;;  %s1202_s1 = inlined_call_operand.vmem [shape: f32[8,256], index: 1, kind: input, shape index: {}]   ;;  %s1203_s2 = inlined_call_operand.vmem [shape: f32[8,1024], index: 2, kind: output, shape index: {}]  }
   0x1   :  { %s13_s10 = sshll.u32 %s1129_s9, 4  ;;  %s1105_s13 = scalar_lea.hbm %s1201_s0, 16384  ;;  %s14_s10 = int_to_ptr.vmem [resolvable:$true] %s13_s10 }
   0x2   :  { %p1106_p0 = scmp.ne.s32.totalorder %s1201_s0, %s1105_s13  ;;  %p1109_p1 = scmp.lt.u32.totalorder %s1105_s13, %s1201_s0 }
   0x4   :  { %p1111_p2 = pnand %p1109_p1, %p1106_p0 }
   0x6   :  { %1114 = shalt.err (!%p1111_p2)
}
   0x7   :  { %s1115_s18 = scalar_lea.vmem %s14_s10, 16384  ;;  %p1120_p4 = scmp.lt.s32.totalorder %s14_s10, %s14_s10 }
   0x8   :  { %p1116_p3 = scmp.ne.s32.totalorder %s14_s10, %s1115_s18  ;;  %p1121_p5 = scmp.lt.s32.totalorder %s1115_s18, %s1115_s18 }
   0xa   :  { %p1122_p6 = por %p1121_p5, %p1120_p4 }
   0xc   :  { %p1123_p7 = pnand %p1122_p6, %p1116_p3 }
   0xe   :  { %1126 = shalt.err (!%p1123_p7)
}
   0xf   :  { %s1130_s19 = smov 512   ;;  %s1131_s20 = smov 32  }
  0x10   :  { %19 = dma.hbm_to_vmem [thread:$0]  %s1201_s0, 16384, %s14_s10, [#allocation3], %s1130_s19, %s1130_s19, %s1131_s20  }
  0x11   :  { %1127 = dma.done.wait [#allocation3], 16384  }
  0x12   :  { %1128 = vsyncadd [#allocation3], 4294950912  ;;  %v29_v0 = vld [vmem:[#allocation2] sm:$0xff]  ;;  %v30_v2 = vld [vmem:[#allocation2 + $0x8] sm:$0xff] }
  0x13   :  { %v33_v1 = vld [vmem:[#allocation2 + $0x20] sm:$0xff]  ;;  %v34_v4 = vld [vmem:[#allocation2 + $0x28] sm:$0xff] }
  0x14   :  { %v975_v3 = vcombine.high %v29_v0, %v33_v1  ;;  %v974_v5 = vcombine.low %v29_v0, %v33_v1  ;;  %v37_v6 = vld [vmem:[#allocation2 + $0x40] sm:$0xff]  ;;  %v977_v8 = vcombine.high %v30_v2, %v34_v4  ;;  %v976_v9 = vcombine.low %v30_v2, %v34_v4  ;;  %v38_v11 = vld [vmem:[#allocation2 + $0x48] sm:$0xff] }
  0x15   :  { %v41_v7 = vld [vmem:[#allocation2 + $0x60] sm:$0xff]  ;;  %v42_v12 = vld [vmem:[#allocation2 + $0x68] sm:$0xff] }
  0x16   :  { %v983_v10 = vcombine.high %v37_v6, %v41_v7  ;;  %v45_v13 = vld [vmem:[#allocation2 + $0x80] sm:$0xff]  ;;  %797 = vmatprep.subr.bf16.mxu0 %v975_v3  ;;  %v985_v14 = vcombine.high %v38_v11, %v42_v12  ;;  %v46_v16 = vld [vmem:[#allocation2 + $0x88] sm:$0xff]  ;;  %838 = vmatprep.subr.bf16.mxu1 %v977_v8  ;;  %v982_v18 = vcombine.low %v37_v6, %v41_v7 }
  0x17   :  { %v49_v15 = vld [vmem:[#allocation2 + $0xa0] sm:$0xff]  ;;  %v50_v17 = vld [vmem:[#allocation2 + $0xa8] sm:$0xff]  ;;  %798 = vmatpush1.bf16.msra.mxu0 %v974_v5  ;;  %839 = vmatpush1.bf16.msra.mxu1 %v976_v9  ;;  %v984_v19 = vcombine.low %v38_v11, %v42_v12 }
  0x18   :  { %799 = vmatprep.subr.bf16.mxu0 %v983_v10  ;;  %v991_v20 = vcombine.high %v45_v13, %v49_v15  ;;  %840 = vmatprep.subr.bf16.mxu1 %v985_v14  ;;  %v993_v21 = vcombine.high %v46_v16, %v50_v17  ;;  %v53_v22 = vld [vmem:[#allocation2 + $0xc0] sm:$0xff]  ;;  %v54_v24 = vld [vmem:[#allocation2 + $0xc8] sm:$0xff]  ;;  %v990_v26 = vcombine.low %v45_v13, %v49_v15 }
  0x19   :  { %v57_v23 = vld [vmem:[#allocation2 + $0xe0] sm:$0xff]  ;;  %v58_v25 = vld [vmem:[#allocation2 + $0xe8] sm:$0xff]  ;;  %v992_v27 = vcombine.low %v46_v16, %v50_v17 }
  0x1a   :  { %v999_v28 = vcombine.high %v53_v22, %v57_v23  ;;  %v1001_v29 = vcombine.high %v54_v24, %v58_v25  ;;  %v61_v30 = vld [vmem:[#allocation2 + $0x100] sm:$0xff]  ;;  %v62_v32 = vld [vmem:[#allocation2 + $0x108] sm:$0xff]  ;;  %v998_v34 = vcombine.low %v53_v22, %v57_v23  ;;  %v1000_v35 = vcombine.low %v54_v24, %v58_v25 }
  0x1b   :  { %800 = vmatpush1.bf16.msra.mxu0 %v982_v18  ;;  %841 = vmatpush1.bf16.msra.mxu1 %v984_v19  ;;  %v65_v31 = vld [vmem:[#allocation2 + $0x120] sm:$0xff]  ;;  %v66_v33 = vld [vmem:[#allocation2 + $0x128] sm:$0xff] }
  0x1c   :  { %801 = vmatprep.subr.bf16.mxu0 %v991_v20  ;;  %842 = vmatprep.subr.bf16.mxu1 %v993_v21  ;;  %v1007_v36 = vcombine.high %v61_v30, %v65_v31  ;;  %v1009_v37 = vcombine.high %v62_v32, %v66_v33  ;;  %v69_v38 = vld [vmem:[#allocation2 + $0x140] sm:$0xff]  ;;  %v70_v40 = vld [vmem:[#allocation2 + $0x148] sm:$0xff]  ;;  %v1006_v42 = vcombine.low %v61_v30, %v65_v31 }
  0x1d   :  { %v73_v39 = vld [vmem:[#allocation2 + $0x160] sm:$0xff]  ;;  %v74_v41 = vld [vmem:[#allocation2 + $0x168] sm:$0xff]  ;;  %v1008_v43 = vcombine.low %v62_v32, %v66_v33 }
  0x1e   :  { %v1015_v44 = vcombine.high %v69_v38, %v73_v39  ;;  %v1017_v45 = vcombine.high %v70_v40, %v74_v41  ;;  %v77_v46 = vld [vmem:[#allocation2 + $0x180] sm:$0xff]  ;;  %v78_v48 = vld [vmem:[#allocation2 + $0x188] sm:$0xff]  ;;  %v1014_v50 = vcombine.low %v69_v38, %v73_v39  ;;  %v1016_v51 = vcombine.low %v70_v40, %v74_v41 }
  0x1f   :  { %802 = vmatpush1.bf16.msra.mxu0 %v990_v26  ;;  %843 = vmatpush1.bf16.msra.mxu1 %v992_v27  ;;  %v81_v47 = vld [vmem:[#allocation2 + $0x1a0] sm:$0xff]  ;;  %v82_v49 = vld [vmem:[#allocation2 + $0x1a8] sm:$0xff] }
  0x20   :  { %803 = vmatprep.subr.bf16.mxu0 %v999_v28  ;;  %844 = vmatprep.subr.bf16.mxu1 %v1001_v29  ;;  %v1023_v52 = vcombine.high %v77_v46, %v81_v47  ;;  %v26_v53 = vld [vmem:[%s1202_s1 + $0x8] sm:$0xff]  ;;  %v1025_v54 = vcombine.high %v78_v48, %v82_v49  ;;  %v85_v55 = vld [vmem:[#allocation2 + $0x1c0] sm:$0xff]  ;;  %v1022_v60 = vcombine.low %v77_v46, %v81_v47 }
  0x21   :  { %v89_v56 = vld [vmem:[#allocation2 + $0x1e0] sm:$0xff]  ;;  %v1162_v57 = vpack.c.bf16 %v26_v53, %v26_v53  ;;  %v86_v58 = vld [vmem:[#allocation2 + $0x1c8] sm:$0xff]  ;;  %v1024_v61 = vcombine.low %v78_v48, %v82_v49 }
  0x22   :  { %v90_v59 = vld [vmem:[#allocation2 + $0x1e8] sm:$0xff]  ;;  %v1031_v62 = vcombine.high %v85_v55, %v89_v56  ;;  %v93_v0 = vld [vmem:[#allocation2 + $0x200] sm:$0xff]  ;;  %v1030_v4 = vcombine.low %v85_v55, %v89_v56 }
  0x23   :  { %804 = vmatpush1.bf16.msra.mxu0 %v998_v34  ;;  %845 = vmatpush1.bf16.msra.mxu1 %v1000_v35  ;;  %v1033_v63 = vcombine.high %v86_v58, %v90_v59  ;;  %v97_v1 = vld [vmem:[#allocation2 + $0x220] sm:$0xff]  ;;  %v94_v2 = vld [vmem:[#allocation2 + $0x208] sm:$0xff]  ;;  %v1032_v5 = vcombine.low %v86_v58, %v90_v59 }
  0x24   :  { %805 = vmatprep.subr.bf16.mxu0 %v1007_v36  ;;  %846 = vmatprep.subr.bf16.mxu1 %v1009_v37  ;;  %v98_v3 = vld [vmem:[#allocation2 + $0x228] sm:$0xff]  ;;  %v1039_v6 = vcombine.high %v93_v0, %v97_v1  ;;  %v101_v8 = vld [vmem:[#allocation2 + $0x240] sm:$0xff]  ;;  %v1038_v12 = vcombine.low %v93_v0, %v97_v1  ;;  %v31_v1 = vld [vmem:[#allocation2 + $0x10] sm:$0xff] }
  0x25   :  { %829 = vmatprep.mubr.bf16.mxu0 %v1162_v57  ;;  %870 = vmatprep.mubr.bf16.mxu1 %v1162_v57  ;;  %v1041_v7 = vcombine.high %v94_v2, %v98_v3  ;;  %v105_v9 = vld [vmem:[#allocation2 + $0x260] sm:$0xff]  ;;  %v102_v10 = vld [vmem:[#allocation2 + $0x248] sm:$0xff]  ;;  %v1040_v13 = vcombine.low %v94_v2, %v98_v3  ;;  %v35_v2 = vld [vmem:[#allocation2 + $0x30] sm:$0xff] }
  0x26   :  { %v106_v11 = vld [vmem:[#allocation2 + $0x268] sm:$0xff]  ;;  %v1047_v14 = vcombine.high %v101_v8, %v105_v9  ;;  %v109_v16 = vld [vmem:[#allocation2 + $0x280] sm:$0xff]  ;;  %v1046_v20 = vcombine.low %v101_v8, %v105_v9  ;;  %v32_v3 = vld [vmem:[#allocation2 + $0x18] sm:$0xff]  ;;  %v979_v8 = vcombine.high %v31_v1, %v35_v2 }
  0x27   :  { %806 = vmatpush1.bf16.msra.mxu0 %v1006_v42  ;;  %847 = vmatpush1.bf16.msra.mxu1 %v1008_v43  ;;  %v1049_v15 = vcombine.high %v102_v10, %v106_v11  ;;  %v113_v17 = vld [vmem:[#allocation2 + $0x2a0] sm:$0xff]  ;;  %v110_v18 = vld [vmem:[#allocation2 + $0x288] sm:$0xff]  ;;  %v1048_v21 = vcombine.low %v102_v10, %v106_v11  ;;  %v39_v10 = vld [vmem:[#allocation2 + $0x50] sm:$0xff] }
  0x28   :  { %807 = vmatprep.subr.bf16.mxu0 %v1015_v44  ;;  %848 = vmatprep.subr.bf16.mxu1 %v1017_v45  ;;  %v114_v19 = vld [vmem:[#allocation2 + $0x2a8] sm:$0xff]  ;;  %v1055_v22 = vcombine.high %v109_v16, %v113_v17  ;;  %v117_v24 = vld [vmem:[#allocation2 + $0x2c0] sm:$0xff]  ;;  %v1054_v28 = vcombine.low %v109_v16, %v113_v17  ;;  %v43_v11 = vld [vmem:[#allocation2 + $0x70] sm:$0xff] }
  0x29   :  { %v1057_v23 = vcombine.high %v110_v18, %v114_v19  ;;  %v121_v25 = vld [vmem:[#allocation2 + $0x2e0] sm:$0xff]  ;;  %v118_v26 = vld [vmem:[#allocation2 + $0x2c8] sm:$0xff]  ;;  %v1056_v29 = vcombine.low %v110_v18, %v114_v19  ;;  %v987_v17 = vcombine.high %v39_v10, %v43_v11  ;;  %v47_v19 = vld [vmem:[#allocation2 + $0x90] sm:$0xff] }
  0x2a   :  { %v122_v27 = vld [vmem:[#allocation2 + $0x2e8] sm:$0xff]  ;;  %v1063_v30 = vcombine.high %v117_v24, %v121_v25  ;;  %v125_v32 = vld [vmem:[#allocation2 + $0x300] sm:$0xff]  ;;  %v1062_v36 = vcombine.low %v117_v24, %v121_v25 }
  0x2b   :  { %808 = vmatpush1.bf16.msra.mxu0 %v1014_v50  ;;  %849 = vmatpush1.bf16.msra.mxu1 %v1016_v51  ;;  %v1065_v31 = vcombine.high %v118_v26, %v122_v27  ;;  %v129_v33 = vld [vmem:[#allocation2 + $0x320] sm:$0xff]  ;;  %v126_v34 = vld [vmem:[#allocation2 + $0x308] sm:$0xff]  ;;  %v1064_v37 = vcombine.low %v118_v26, %v122_v27  ;;  %v55_v27 = vld [vmem:[#allocation2 + $0xd0] sm:$0xff] }
  0x2c   :  { %809 = vmatprep.subr.bf16.mxu0 %v1023_v52  ;;  %850 = vmatprep.subr.bf16.mxu1 %v1025_v54  ;;  %v130_v35 = vld [vmem:[#allocation2 + $0x328] sm:$0xff]  ;;  %v1071_v38 = vcombine.high %v125_v32, %v129_v33  ;;  %v133_v40 = vld [vmem:[#allocation2 + $0x340] sm:$0xff]  ;;  %v1070_v44 = vcombine.low %v125_v32, %v129_v33 }
  0x2d   :  { %v1073_v39 = vcombine.high %v126_v34, %v130_v35  ;;  %v137_v41 = vld [vmem:[#allocation2 + $0x360] sm:$0xff]  ;;  %v134_v42 = vld [vmem:[#allocation2 + $0x348] sm:$0xff]  ;;  %v1072_v45 = vcombine.low %v126_v34, %v130_v35  ;;  %v63_v35 = vld [vmem:[#allocation2 + $0x110] sm:$0xff] }
  0x2e   :  { %v138_v43 = vld [vmem:[#allocation2 + $0x368] sm:$0xff]  ;;  %v1079_v46 = vcombine.high %v133_v40, %v137_v41  ;;  %v141_v48 = vld [vmem:[#allocation2 + $0x380] sm:$0xff]  ;;  %v1078_v52 = vcombine.low %v133_v40, %v137_v41 }
  0x2f   :  { %810 = vmatpush1.bf16.msra.mxu0 %v1022_v60  ;;  %851 = vmatpush1.bf16.msra.mxu1 %v1024_v61  ;;  %v1081_v47 = vcombine.high %v134_v42, %v138_v43  ;;  %v145_v49 = vld [vmem:[#allocation2 + $0x3a0] sm:$0xff]  ;;  %v142_v50 = vld [vmem:[#allocation2 + $0x388] sm:$0xff]  ;;  %v1080_v53 = vcombine.low %v134_v42, %v138_v43  ;;  %v71_v42 = vld [vmem:[#allocation2 + $0x150] sm:$0xff] }
  0x30   :  { %811 = vmatprep.subr.bf16.mxu0 %v1031_v62  ;;  %852 = vmatprep.subr.bf16.mxu1 %v1033_v63  ;;  %v146_v51 = vld [vmem:[#allocation2 + $0x3a8] sm:$0xff]  ;;  %v1087_v54 = vcombine.high %v141_v48, %v145_v49  ;;  %v149_v56 = vld [vmem:[#allocation2 + $0x3c0] sm:$0xff]  ;;  %v1086_v61 = vcombine.low %v141_v48, %v145_v49  ;;  %v75_v43 = vld [vmem:[#allocation2 + $0x170] sm:$0xff] }
  0x31   :  { %v1089_v55 = vcombine.high %v142_v50, %v146_v51  ;;  %v153_v58 = vld [vmem:[#allocation2 + $0x3e0] sm:$0xff]  ;;  %v150_v59 = vld [vmem:[#allocation2 + $0x3c8] sm:$0xff]  ;;  %v1088_v62 = vcombine.low %v142_v50, %v146_v51  ;;  %v1019_v48 = vcombine.high %v71_v42, %v75_v43  ;;  %v79_v50 = vld [vmem:[#allocation2 + $0x190] sm:$0xff] }
  0x32   :  { %v154_v60 = vld [vmem:[#allocation2 + $0x3e8] sm:$0xff]  ;;  %v1095_v63 = vcombine.high %v149_v56, %v153_v58  ;;  %v83_v51 = vld [vmem:[#allocation2 + $0x1b0] sm:$0xff] }
  0x33   :  { %812 = vmatpush1.bf16.msra.mxu0 %v1030_v4  ;;  %853 = vmatpush1.bf16.msra.mxu1 %v1032_v5  ;;  %v1097_v0 = vcombine.high %v150_v59, %v154_v60  ;;  %v36_v4 = vld [vmem:[#allocation2 + $0x38] sm:$0xff]  ;;  %v1094_v5 = vcombine.low %v149_v56, %v153_v58  ;;  %v1027_v56 = vcombine.high %v79_v50, %v83_v51 }
  0x34   :  { %813 = vmatprep.subr.bf16.mxu0 %v1039_v6  ;;  %854 = vmatprep.subr.bf16.mxu1 %v1041_v7  ;;  %v25_v6 = vld [vmem:[%s1202_s1] sm:$0xff]  ;;  %v1096_v7 = vcombine.low %v150_v59, %v154_v60  ;;  %v981_v9 = vcombine.high %v32_v3, %v36_v4  ;;  %v980_v16 = vcombine.low %v32_v3, %v36_v4  ;;  %v87_v59 = vld [vmem:[#allocation2 + $0x1d0] sm:$0xff] }
  0x35   :  { %v91_v60 = vld [vmem:[#allocation2 + $0x1f0] sm:$0xff] }
  0x36   :  { %v95_v3 = vld [vmem:[#allocation2 + $0x210] sm:$0xff] }
  0x37   :  { %814 = vmatpush1.bf16.msra.mxu0 %v1038_v12  ;;  %855 = vmatpush1.bf16.msra.mxu1 %v1040_v13  ;;  %v1169_v12 = vpack.c.bf16 %v25_v6, %v25_v6  ;;  %v40_v13 = vld [vmem:[#allocation2 + $0x58] sm:$0xff]  ;;  %v99_v4 = vld [vmem:[#allocation2 + $0x230] sm:$0xff] }
  0x38   :  { %815 = vmatprep.subr.bf16.mxu0 %v1047_v14  ;;  %856 = vmatprep.subr.bf16.mxu1 %v1049_v15  ;;  %v44_v14 = vld [vmem:[#allocation2 + $0x78] sm:$0xff]  ;;  %v978_v15 = vcombine.low %v31_v1, %v35_v2  ;;  %v1035_v1 = vcombine.high %v87_v59, %v91_v60 }
  0x39   :  { %v989_v18 = vcombine.high %v40_v13, %v44_v14  ;;  %v988_v24 = vcombine.low %v40_v13, %v44_v14  ;;  %v100_v6 = vld [vmem:[#allocation2 + $0x238] sm:$0xff]  ;;  %v107_v13 = vld [vmem:[#allocation2 + $0x270] sm:$0xff] }
  0x3a   :  { %v104_v14 = vld [vmem:[#allocation2 + $0x258] sm:$0xff] }
  0x3b   :  { %816 = vmatpush1.bf16.msra.mxu0 %v1046_v20  ;;  %857 = vmatpush1.bf16.msra.mxu1 %v1048_v21  ;;  %v51_v20 = vld [vmem:[#allocation2 + $0xb0] sm:$0xff]  ;;  %v48_v21 = vld [vmem:[#allocation2 + $0x98] sm:$0xff] }
  0x3c   :  { %817 = vmatprep.subr.bf16.mxu0 %v1055_v22  ;;  %858 = vmatprep.subr.bf16.mxu1 %v1057_v23  ;;  %v52_v22 = vld [vmem:[#allocation2 + $0xb8] sm:$0xff]  ;;  %v986_v23 = vcombine.low %v39_v10, %v43_v11  ;;  %v995_v25 = vcombine.high %v47_v19, %v51_v20  ;;  %v103_v11 = vld [vmem:[#allocation2 + $0x250] sm:$0xff] }
  0x3d   :  { %v997_v26 = vcombine.high %v48_v21, %v52_v22  ;;  %v996_v32 = vcombine.low %v48_v21, %v52_v22  ;;  %v115_v21 = vld [vmem:[#allocation2 + $0x2b0] sm:$0xff]  ;;  %v112_v22 = vld [vmem:[#allocation2 + $0x298] sm:$0xff] }
  0x3f   :  { %818 = vmatpush1.bf16.msra.mxu0 %v1054_v28  ;;  %859 = vmatpush1.bf16.msra.mxu1 %v1056_v29  ;;  %v59_v28 = vld [vmem:[#allocation2 + $0xf0] sm:$0xff]  ;;  %v56_v29 = vld [vmem:[#allocation2 + $0xd8] sm:$0xff] }
  0x40   :  { %819 = vmatprep.subr.bf16.mxu0 %v1063_v30  ;;  %860 = vmatprep.subr.bf16.mxu1 %v1065_v31  ;;  %v60_v30 = vld [vmem:[#allocation2 + $0xf8] sm:$0xff]  ;;  %v994_v31 = vcombine.low %v47_v19, %v51_v20  ;;  %v1003_v33 = vcombine.high %v55_v27, %v59_v28  ;;  %v111_v20 = vld [vmem:[#allocation2 + $0x290] sm:$0xff] }
  0x41   :  { %v1005_v34 = vcombine.high %v56_v29, %v60_v30  ;;  %v1004_v40 = vcombine.low %v56_v29, %v60_v30  ;;  %v123_v29 = vld [vmem:[#allocation2 + $0x2f0] sm:$0xff]  ;;  %v120_v30 = vld [vmem:[#allocation2 + $0x2d8] sm:$0xff] }
  0x43   :  { %820 = vmatpush1.bf16.msra.mxu0 %v1062_v36  ;;  %861 = vmatpush1.bf16.msra.mxu1 %v1064_v37  ;;  %v67_v36 = vld [vmem:[#allocation2 + $0x130] sm:$0xff]  ;;  %v64_v37 = vld [vmem:[#allocation2 + $0x118] sm:$0xff] }
  0x44   :  { %821 = vmatprep.subr.bf16.mxu0 %v1071_v38  ;;  %862 = vmatprep.subr.bf16.mxu1 %v1073_v39  ;;  %v68_v38 = vld [vmem:[#allocation2 + $0x138] sm:$0xff]  ;;  %v1002_v39 = vcombine.low %v55_v27, %v59_v28  ;;  %v1011_v41 = vcombine.high %v63_v35, %v67_v36  ;;  %v119_v28 = vld [vmem:[#allocation2 + $0x2d0] sm:$0xff] }
  0x47   :  { %822 = vmatpush1.bf16.msra.mxu0 %v1070_v44  ;;  %863 = vmatpush1.bf16.msra.mxu1 %v1072_v45  ;;  %v72_v44 = vld [vmem:[#allocation2 + $0x158] sm:$0xff] }
  0x48   :  { %823 = vmatprep.subr.bf16.mxu0 %v1079_v46  ;;  %864 = vmatprep.subr.bf16.mxu1 %v1081_v47  ;;  %v76_v45 = vld [vmem:[#allocation2 + $0x178] sm:$0xff]  ;;  %v1010_v46 = vcombine.low %v63_v35, %v67_v36  ;;  %v1012_v47 = vcombine.low %v64_v37, %v68_v38  ;;  %v127_v36 = vld [vmem:[#allocation2 + $0x310] sm:$0xff] }
  0x49   :  { %v1021_v49 = vcombine.high %v72_v44, %v76_v45 }
  0x4b   :  { %824 = vmatpush1.bf16.msra.mxu0 %v1078_v52  ;;  %865 = vmatpush1.bf16.msra.mxu1 %v1080_v53  ;;  %v80_v52 = vld [vmem:[#allocation2 + $0x198] sm:$0xff] }
  0x4c   :  { %825 = vmatprep.subr.bf16.mxu0 %v1087_v54  ;;  %866 = vmatprep.subr.bf16.mxu1 %v1089_v55  ;;  %v84_v53 = vld [vmem:[#allocation2 + $0x1b8] sm:$0xff]  ;;  %v1018_v54 = vcombine.low %v71_v42, %v75_v43  ;;  %v1020_v55 = vcombine.low %v72_v44, %v76_v45  ;;  %v135_v43 = vld [vmem:[#allocation2 + $0x350] sm:$0xff] }
  0x4d   :  { %v1029_v58 = vcombine.high %v80_v52, %v84_v53  ;;  %v139_v44 = vld [vmem:[#allocation2 + $0x370] sm:$0xff]  ;;  %v136_v45 = vld [vmem:[#allocation2 + $0x358] sm:$0xff] }
  0x4f   :  { %826 = vmatpush1.bf16.msra.mxu0 %v1086_v61  ;;  %867 = vmatpush1.bf16.msra.mxu1 %v1088_v62  ;;  %v88_v61 = vld [vmem:[#allocation2 + $0x1d8] sm:$0xff] }
  0x50   :  { %827 = vmatprep.subr.bf16.mxu0 %v1095_v63  ;;  %868 = vmatprep.subr.bf16.mxu1 %v1097_v0  ;;  %v92_v62 = vld [vmem:[#allocation2 + $0x1f8] sm:$0xff]  ;;  %v1026_v63 = vcombine.low %v79_v50, %v83_v51  ;;  %v1028_v0 = vcombine.low %v80_v52, %v84_v53  ;;  %v143_v51 = vld [vmem:[#allocation2 + $0x390] sm:$0xff] }
  0x51   :  { %v1037_v2 = vcombine.high %v88_v61, %v92_v62  ;;  %v147_v52 = vld [vmem:[#allocation2 + $0x3b0] sm:$0xff]  ;;  %v144_v53 = vld [vmem:[#allocation2 + $0x398] sm:$0xff] }
  0x53   :  { %828 = vmatpush1.bf16.msra.mxu0 %v1094_v5  ;;  %869 = vmatpush1.bf16.msra.mxu1 %v1096_v7  ;;  %v96_v5 = vld [vmem:[#allocation2 + $0x218] sm:$0xff]  ;;  %v1034_v7 = vcombine.low %v87_v59, %v91_v60  ;;  %v151_v60 = vld [vmem:[#allocation2 + $0x3d0] sm:$0xff] }
  0x54   :  { %879 = vmatprep.subr.bf16.mxu0 %v979_v8  ;;  %920 = vmatprep.subr.bf16.mxu1 %v981_v9  ;;  %v1036_v8 = vcombine.low %v88_v61, %v92_v62  ;;  %v1043_v9 = vcombine.high %v95_v3, %v99_v4  ;;  %v1045_v10 = vcombine.high %v96_v5, %v100_v6  ;;  %v155_v61 = vld [vmem:[#allocation2 + $0x3f0] sm:$0xff]  ;;  %v152_v62 = vld [vmem:[#allocation2 + $0x3d8] sm:$0xff] }
  0x56   :  { %830 = vmatmul.mubr.bf16.vlgmr.msra.gmra.mrb[0].mxu0 %v1169_v12  ;;  %871 = vmatmul.mubr.bf16.vlgmr.msra.gmra.mrb[0].mxu1 %v1169_v12 }
  0x57   :  { %880 = vmatpush1.bf16.msra.mxu0 %v978_v15  ;;  %921 = vmatpush1.bf16.msra.mxu1 %v980_v16  ;;  %v108_v15 = vld [vmem:[#allocation2 + $0x278] sm:$0xff]  ;;  %v1042_v16 = vcombine.low %v95_v3, %v99_v4  ;;  %v1098_v4 = vcombine.low %v151_v60, %v155_v61 }
  0x58   :  { %881 = vmatprep.subr.bf16.mxu0 %v987_v17  ;;  %922 = vmatprep.subr.bf16.mxu1 %v989_v18  ;;  %v1044_v17 = vcombine.low %v96_v5, %v100_v6  ;;  %v1051_v18 = vcombine.high %v103_v11, %v107_v13  ;;  %v1053_v19 = vcombine.high %v104_v14, %v108_v15 }
  0x59   :  { %911 = vmatprep.mubr.bf16.mxu0 %v1162_v57  ;;  %952 = vmatprep.mubr.bf16.mxu1 %v1162_v57  ;;  %v1013_v57 = vcombine.high %v64_v37, %v68_v38  ;;  %v131_v37 = vld [vmem:[#allocation2 + $0x330] sm:$0xff]  ;;  %v128_v38 = vld [vmem:[#allocation2 + $0x318] sm:$0xff] }
  0x5b   :  { %882 = vmatpush1.bf16.msra.mxu0 %v986_v23  ;;  %923 = vmatpush1.bf16.msra.mxu1 %v988_v24  ;;  %v116_v23 = vld [vmem:[#allocation2 + $0x2b8] sm:$0xff]  ;;  %v1050_v24 = vcombine.low %v103_v11, %v107_v13 }
  0x5c   :  { %883 = vmatprep.subr.bf16.mxu0 %v995_v25  ;;  %924 = vmatprep.subr.bf16.mxu1 %v997_v26  ;;  %v1052_v25 = vcombine.low %v104_v14, %v108_v15  ;;  %v1059_v26 = vcombine.high %v111_v20, %v115_v21  ;;  %v1061_v27 = vcombine.high %v112_v22, %v116_v23 }
  0x5f   :  { %884 = vmatpush1.bf16.msra.mxu0 %v994_v31  ;;  %925 = vmatpush1.bf16.msra.mxu1 %v996_v32  ;;  %v124_v31 = vld [vmem:[#allocation2 + $0x2f8] sm:$0xff]  ;;  %v1058_v32 = vcombine.low %v111_v20, %v115_v21 }
  0x60   :  { %885 = vmatprep.subr.bf16.mxu0 %v1003_v33  ;;  %926 = vmatprep.subr.bf16.mxu1 %v1005_v34  ;;  %v1060_v33 = vcombine.low %v112_v22, %v116_v23  ;;  %v1067_v34 = vcombine.high %v119_v28, %v123_v29  ;;  %v1069_v35 = vcombine.high %v120_v30, %v124_v31 }
  0x63   :  { %886 = vmatpush1.bf16.msra.mxu0 %v1002_v39  ;;  %927 = vmatpush1.bf16.msra.mxu1 %v1004_v40  ;;  %v132_v39 = vld [vmem:[#allocation2 + $0x338] sm:$0xff]  ;;  %v1066_v40 = vcombine.low %v119_v28, %v123_v29 }
  0x64   :  { %887 = vmatprep.subr.bf16.mxu0 %v1011_v41  ;;  %928 = vmatprep.subr.bf16.mxu1 %v1013_v57  ;;  %v1068_v41 = vcombine.low %v120_v30, %v124_v31  ;;  %v1075_v57 = vcombine.high %v127_v36, %v131_v37  ;;  %v1077_v42 = vcombine.high %v128_v38, %v132_v39 }
  0x67   :  { %888 = vmatpush1.bf16.msra.mxu0 %v1010_v46  ;;  %929 = vmatpush1.bf16.msra.mxu1 %v1012_v47  ;;  %v140_v46 = vld [vmem:[#allocation2 + $0x378] sm:$0xff]  ;;  %v1074_v47 = vcombine.low %v127_v36, %v131_v37 }
  0x68   :  { %889 = vmatprep.subr.bf16.mxu0 %v1019_v48  ;;  %930 = vmatprep.subr.bf16.mxu1 %v1021_v49  ;;  %v1076_v48 = vcombine.low %v128_v38, %v132_v39  ;;  %v1083_v49 = vcombine.high %v135_v43, %v139_v44  ;;  %v1085_v50 = vcombine.high %v136_v45, %v140_v46 }
  0x6b   :  { %890 = vmatpush1.bf16.msra.mxu0 %v1018_v54  ;;  %931 = vmatpush1.bf16.msra.mxu1 %v1020_v55  ;;  %v148_v54 = vld [vmem:[#allocation2 + $0x3b8] sm:$0xff]  ;;  %v1082_v55 = vcombine.low %v135_v43, %v139_v44 }
  0x6c   :  { %891 = vmatprep.subr.bf16.mxu0 %v1027_v56  ;;  %932 = vmatprep.subr.bf16.mxu1 %v1029_v58  ;;  %v1084_v56 = vcombine.low %v136_v45, %v140_v46  ;;  %v1091_v58 = vcombine.high %v143_v51, %v147_v52  ;;  %v1093_v59 = vcombine.high %v144_v53, %v148_v54 }
  0x6f   :  { %892 = vmatpush1.bf16.msra.mxu0 %v1026_v63  ;;  %933 = vmatpush1.bf16.msra.mxu1 %v1028_v0  ;;  %v156_v63 = vld [vmem:[#allocation2 + $0x3f8] sm:$0xff]  ;;  %v1090_v0 = vcombine.low %v143_v51, %v147_v52 }
  0x70   :  { %893 = vmatprep.subr.bf16.mxu0 %v1035_v1  ;;  %934 = vmatprep.subr.bf16.mxu1 %v1037_v2  ;;  %v1092_v1 = vcombine.low %v144_v53, %v148_v54  ;;  %v1099_v2 = vcombine.high %v151_v60, %v155_v61  ;;  %v1101_v3 = vcombine.high %v152_v62, %v156_v63 }
  0x71   :  { %v1100_v5 = vcombine.low %v152_v62, %v156_v63 }
  0x73   :  { %894 = vmatpush1.bf16.msra.mxu0 %v1034_v7  ;;  %935 = vmatpush1.bf16.msra.mxu1 %v1036_v8 }
  0x74   :  { %895 = vmatprep.subr.bf16.mxu0 %v1043_v9  ;;  %936 = vmatprep.subr.bf16.mxu1 %v1045_v10 }
  0x77   :  { %896 = vmatpush1.bf16.msra.mxu0 %v1042_v16  ;;  %937 = vmatpush1.bf16.msra.mxu1 %v1044_v17 }
  0x78   :  { %897 = vmatprep.subr.bf16.mxu0 %v1051_v18  ;;  %938 = vmatprep.subr.bf16.mxu1 %v1053_v19 }
  0x7b   :  { %898 = vmatpush1.bf16.msra.mxu0 %v1050_v24  ;;  %939 = vmatpush1.bf16.msra.mxu1 %v1052_v25 }
  0x7c   :  { %899 = vmatprep.subr.bf16.mxu0 %v1059_v26  ;;  %940 = vmatprep.subr.bf16.mxu1 %v1061_v27 }
  0x7f   :  { %900 = vmatpush1.bf16.msra.mxu0 %v1058_v32  ;;  %941 = vmatpush1.bf16.msra.mxu1 %v1060_v33 }
  0x80   :  { %901 = vmatprep.subr.bf16.mxu0 %v1067_v34  ;;  %942 = vmatprep.subr.bf16.mxu1 %v1069_v35 }
  0x83   :  { %902 = vmatpush1.bf16.msra.mxu0 %v1066_v40  ;;  %943 = vmatpush1.bf16.msra.mxu1 %v1068_v41 }
  0x84   :  { %903 = vmatprep.subr.bf16.mxu0 %v1075_v57  ;;  %944 = vmatprep.subr.bf16.mxu1 %v1077_v42 }
  0x87   :  { %904 = vmatpush1.bf16.msra.mxu0 %v1074_v47  ;;  %945 = vmatpush1.bf16.msra.mxu1 %v1076_v48 }
  0x88   :  { %905 = vmatprep.subr.bf16.mxu0 %v1083_v49  ;;  %946 = vmatprep.subr.bf16.mxu1 %v1085_v50 }
  0x8b   :  { %906 = vmatpush1.bf16.msra.mxu0 %v1082_v55  ;;  %947 = vmatpush1.bf16.msra.mxu1 %v1084_v56 }
  0x8c   :  { %907 = vmatprep.subr.bf16.mxu0 %v1091_v58  ;;  %948 = vmatprep.subr.bf16.mxu1 %v1093_v59 }
  0x8f   :  { %908 = vmatpush1.bf16.msra.mxu0 %v1090_v0  ;;  %949 = vmatpush1.bf16.msra.mxu1 %v1092_v1 }
  0x90   :  { %909 = vmatprep.subr.bf16.mxu0 %v1099_v2  ;;  %950 = vmatprep.subr.bf16.mxu1 %v1101_v3 }
  0x93   :  { %910 = vmatpush1.bf16.msra.mxu0 %v1098_v4  ;;  %951 = vmatpush1.bf16.msra.mxu1 %v1100_v5 }
  0x96   :  { %912 = vmatmul.mubr.bf16.vlgmr.msra.gmra.mrb[4].mxu0 %v1169_v12  ;;  %953 = vmatmul.mubr.bf16.vlgmr.msra.gmra.mrb[4].mxu1 %v1169_v12 }
 0x129   :  { %v831_v6 = vpop.f32.mrb[0].mxu0  ;;  %v872_v7 = vpop.f32.mrb[0].mxu1 }
 0x12a   :  { %961 = vst [vmem:[%s1203_s2] sm:$0xff] %v831_v6  ;;  %v833_v8 = vpop.f32.mrb[1].mxu0  ;;  %963 = vst [vmem:[%s1203_s2 + $0x10] sm:$0xff] %v872_v7  ;;  %v874_v9 = vpop.f32.mrb[1].mxu1 }
 0x12b   :  { %962 = vst [vmem:[%s1203_s2 + $0x8] sm:$0xff] %v833_v8  ;;  %v835_v10 = vpop.f32.mrb[2].mxu0  ;;  %964 = vst [vmem:[%s1203_s2 + $0x18] sm:$0xff] %v874_v9  ;;  %v876_v12 = vpop.f32.mrb[2].mxu1 }
 0x12c   :  { %v836_v11 = vpop.f32.mrb[3].mxu0  ;;  %v877_v13 = vpop.f32.mrb[3].mxu1 }
 0x169   :  { %v913_v14 = vpop.f32.mrb[4].mxu0  ;;  %v954_v15 = vpop.f32.mrb[4].mxu1 }
 0x16a   :  { %965 = vst [vmem:[%s1203_s2 + $0x20] sm:$0xff] %v913_v14  ;;  %v915_v16 = vpop.f32.mrb[5].mxu0  ;;  %967 = vst [vmem:[%s1203_s2 + $0x30] sm:$0xff] %v954_v15  ;;  %v956_v17 = vpop.f32.mrb[5].mxu1 }
 0x16b   :  { %966 = vst [vmem:[%s1203_s2 + $0x28] sm:$0xff] %v915_v16  ;;  %v917_v18 = vpop.f32.mrb[6].mxu0  ;;  %968 = vst [vmem:[%s1203_s2 + $0x38] sm:$0xff] %v956_v17  ;;  %v958_v19 = vpop.f32.mrb[6].mxu1 }
 0x16c   :  { %v918_v20 = vpop.f32.mrb[7].mxu0  ;;  %v959_v21 = vpop.f32.mrb[7].mxu1 }
 0x16d   :  { %973 = vsyncpa [#allocation3], 1 }

// kernel: _kron_interp.1
= control target key start
LH: loop header
LB: loop body
LE: loop exit
PB: predicated region body
PF: predicated region fallthrough
CT: control target
= control target key end

     0   :  { %7 = vsyncpa [#allocation3], 0  ;;  %s1129_s9 = smov [#allocation2]   ;;  %s1201_s0 = inlined_call_operand.hbm [shape: bf16[256,1024], index: 0, kind: input, shape index: {}]   ;;  %s1202_s1 = inlined_call_operand.vmem [shape: f32[8,256], index: 1, kind: input, shape index: {}]   ;;  %s1203_s2 = inlined_call_operand.vmem [shape: f32[8,1024], index: 2, kind: output, shape index: {}]  }
   0x1   :  { %s13_s10 = sshll.u32 %s1129_s9, 4  ;;  %s1105_s13 = scalar_lea.hbm %s1201_s0, 16384  ;;  %s14_s10 = int_to_ptr.vmem [resolvable:$true] %s13_s10 }
   0x2   :  { %p1106_p0 = scmp.ne.s32.totalorder %s1201_s0, %s1105_s13  ;;  %p1109_p1 = scmp.lt.u32.totalorder %s1105_s13, %s1201_s0 }
   0x4   :  { %p1111_p2 = pnand %p1109_p1, %p1106_p0 }
   0x6   :  { %1114 = shalt.err (!%p1111_p2)
}
   0x7   :  { %s1115_s18 = scalar_lea.vmem %s14_s10, 16384  ;;  %p1120_p4 = scmp.lt.s32.totalorder %s14_s10, %s14_s10 }
   0x8   :  { %p1116_p3 = scmp.ne.s32.totalorder %s14_s10, %s1115_s18  ;;  %p1121_p5 = scmp.lt.s32.totalorder %s1115_s18, %s1115_s18 }
   0xa   :  { %p1122_p6 = por %p1121_p5, %p1120_p4 }
   0xc   :  { %p1123_p7 = pnand %p1122_p6, %p1116_p3 }
   0xe   :  { %1126 = shalt.err (!%p1123_p7)
}
   0xf   :  { %s1130_s19 = smov 512   ;;  %s1131_s20 = smov 32  }
  0x10   :  { %19 = dma.hbm_to_vmem [thread:$0]  %s1201_s0, 16384, %s14_s10, [#allocation3], %s1130_s19, %s1130_s19, %s1131_s20  }
  0x11   :  { %1127 = dma.done.wait [#allocation3], 16384  }
  0x12   :  { %1128 = vsyncadd [#allocation3], 4294950912  ;;  %v29_v0 = vld [vmem:[#allocation2] sm:$0xff]  ;;  %v30_v2 = vld [vmem:[#allocation2 + $0x8] sm:$0xff] }
  0x13   :  { %v33_v1 = vld [vmem:[#allocation2 + $0x20] sm:$0xff]  ;;  %v34_v4 = vld [vmem:[#allocation2 + $0x28] sm:$0xff] }
  0x14   :  { %v975_v3 = vcombine.high %v29_v0, %v33_v1  ;;  %v974_v5 = vcombine.low %v29_v0, %v33_v1  ;;  %v37_v6 = vld [vmem:[#allocation2 + $0x40] sm:$0xff]  ;;  %v977_v8 = vcombine.high %v30_v2, %v34_v4  ;;  %v976_v9 = vcombine.low %v30_v2, %v34_v4  ;;  %v38_v11 = vld [vmem:[#allocation2 + $0x48] sm:$0xff] }
  0x15   :  { %v41_v7 = vld [vmem:[#allocation2 + $0x60] sm:$0xff]  ;;  %v42_v12 = vld [vmem:[#allocation2 + $0x68] sm:$0xff] }
  0x16   :  { %v983_v10 = vcombine.high %v37_v6, %v41_v7  ;;  %v45_v13 = vld [vmem:[#allocation2 + $0x80] sm:$0xff]  ;;  %797 = vmatprep.subr.bf16.mxu0 %v975_v3  ;;  %v985_v14 = vcombine.high %v38_v11, %v42_v12  ;;  %v46_v16 = vld [vmem:[#allocation2 + $0x88] sm:$0xff]  ;;  %838 = vmatprep.subr.bf16.mxu1 %v977_v8  ;;  %v982_v18 = vcombine.low %v37_v6, %v41_v7 }
  0x17   :  { %v49_v15 = vld [vmem:[#allocation2 + $0xa0] sm:$0xff]  ;;  %v50_v17 = vld [vmem:[#allocation2 + $0xa8] sm:$0xff]  ;;  %798 = vmatpush1.bf16.msra.mxu0 %v974_v5  ;;  %839 = vmatpush1.bf16.msra.mxu1 %v976_v9  ;;  %v984_v19 = vcombine.low %v38_v11, %v42_v12 }
  0x18   :  { %799 = vmatprep.subr.bf16.mxu0 %v983_v10  ;;  %v991_v20 = vcombine.high %v45_v13, %v49_v15  ;;  %840 = vmatprep.subr.bf16.mxu1 %v985_v14  ;;  %v993_v21 = vcombine.high %v46_v16, %v50_v17  ;;  %v53_v22 = vld [vmem:[#allocation2 + $0xc0] sm:$0xff]  ;;  %v54_v24 = vld [vmem:[#allocation2 + $0xc8] sm:$0xff]  ;;  %v990_v26 = vcombine.low %v45_v13, %v49_v15 }
  0x19   :  { %v57_v23 = vld [vmem:[#allocation2 + $0xe0] sm:$0xff]  ;;  %v58_v25 = vld [vmem:[#allocation2 + $0xe8] sm:$0xff]  ;;  %v992_v27 = vcombine.low %v46_v16, %v50_v17 }
  0x1a   :  { %v999_v28 = vcombine.high %v53_v22, %v57_v23  ;;  %v1001_v29 = vcombine.high %v54_v24, %v58_v25  ;;  %v61_v30 = vld [vmem:[#allocation2 + $0x100] sm:$0xff]  ;;  %v62_v32 = vld [vmem:[#allocation2 + $0x108] sm:$0xff]  ;;  %v998_v34 = vcombine.low %v53_v22, %v57_v23  ;;  %v1000_v35 = vcombine.low %v54_v24, %v58_v25 }
  0x1b   :  { %800 = vmatpush1.bf16.msra.mxu0 %v982_v18  ;;  %841 = vmatpush1.bf16.msra.mxu1 %v984_v19  ;;  %v65_v31 = vld [vmem:[#allocation2 + $0x120] sm:$0xff]  ;;  %v66_v33 = vld [vmem:[#allocation2 + $0x128] sm:$0xff] }
  0x1c   :  { %801 = vmatprep.subr.bf16.mxu0 %v991_v20  ;;  %842 = vmatprep.subr.bf16.mxu1 %v993_v21  ;;  %v1007_v36 = vcombine.high %v61_v30, %v65_v31  ;;  %v1009_v37 = vcombine.high %v62_v32, %v66_v33  ;;  %v69_v38 = vld [vmem:[#allocation2 + $0x140] sm:$0xff]  ;;  %v70_v40 = vld [vmem:[#allocation2 + $0x148] sm:$0xff]  ;;  %v1006_v42 = vcombine.low %v61_v30, %v65_v31 }
  0x1d   :  { %v73_v39 = vld [vmem:[#allocation2 + $0x160] sm:$0xff]  ;;  %v74_v41 = vld [vmem:[#allocation2 + $0x168] sm:$0xff]  ;;  %v1008_v43 = vcombine.low %v62_v32, %v66_v33 }
  0x1e   :  { %v1015_v44 = vcombine.high %v69_v38, %v73_v39  ;;  %v1017_v45 = vcombine.high %v70_v40, %v74_v41  ;;  %v77_v46 = vld [vmem:[#allocation2 + $0x180] sm:$0xff]  ;;  %v78_v48 = vld [vmem:[#allocation2 + $0x188] sm:$0xff]  ;;  %v1014_v50 = vcombine.low %v69_v38, %v73_v39  ;;  %v1016_v51 = vcombine.low %v70_v40, %v74_v41 }
  0x1f   :  { %802 = vmatpush1.bf16.msra.mxu0 %v990_v26  ;;  %843 = vmatpush1.bf16.msra.mxu1 %v992_v27  ;;  %v81_v47 = vld [vmem:[#allocation2 + $0x1a0] sm:$0xff]  ;;  %v82_v49 = vld [vmem:[#allocation2 + $0x1a8] sm:$0xff] }
  0x20   :  { %803 = vmatprep.subr.bf16.mxu0 %v999_v28  ;;  %844 = vmatprep.subr.bf16.mxu1 %v1001_v29  ;;  %v1023_v52 = vcombine.high %v77_v46, %v81_v47  ;;  %v26_v53 = vld [vmem:[%s1202_s1 + $0x8] sm:$0xff]  ;;  %v1025_v54 = vcombine.high %v78_v48, %v82_v49  ;;  %v85_v55 = vld [vmem:[#allocation2 + $0x1c0] sm:$0xff]  ;;  %v1022_v60 = vcombine.low %v77_v46, %v81_v47 }
  0x21   :  { %v89_v56 = vld [vmem:[#allocation2 + $0x1e0] sm:$0xff]  ;;  %v1162_v57 = vpack.c.bf16 %v26_v53, %v26_v53  ;;  %v86_v58 = vld [vmem:[#allocation2 + $0x1c8] sm:$0xff]  ;;  %v1024_v61 = vcombine.low %v78_v48, %v82_v49 }
  0x22   :  { %v90_v59 = vld [vmem:[#allocation2 + $0x1e8] sm:$0xff]  ;;  %v1031_v62 = vcombine.high %v85_v55, %v89_v56  ;;  %v93_v0 = vld [vmem:[#allocation2 + $0x200] sm:$0xff]  ;;  %v1030_v4 = vcombine.low %v85_v55, %v89_v56 }
  0x23   :  { %804 = vmatpush1.bf16.msra.mxu0 %v998_v34  ;;  %845 = vmatpush1.bf16.msra.mxu1 %v1000_v35  ;;  %v1033_v63 = vcombine.high %v86_v58, %v90_v59  ;;  %v97_v1 = vld [vmem:[#allocation2 + $0x220] sm:$0xff]  ;;  %v94_v2 = vld [vmem:[#allocation2 + $0x208] sm:$0xff]  ;;  %v1032_v5 = vcombine.low %v86_v58, %v90_v59 }
  0x24   :  { %805 = vmatprep.subr.bf16.mxu0 %v1007_v36  ;;  %846 = vmatprep.subr.bf16.mxu1 %v1009_v37  ;;  %v98_v3 = vld [vmem:[#allocation2 + $0x228] sm:$0xff]  ;;  %v1039_v6 = vcombine.high %v93_v0, %v97_v1  ;;  %v101_v8 = vld [vmem:[#allocation2 + $0x240] sm:$0xff]  ;;  %v1038_v12 = vcombine.low %v93_v0, %v97_v1  ;;  %v31_v1 = vld [vmem:[#allocation2 + $0x10] sm:$0xff] }
  0x25   :  { %829 = vmatprep.mubr.bf16.mxu0 %v1162_v57  ;;  %870 = vmatprep.mubr.bf16.mxu1 %v1162_v57  ;;  %v1041_v7 = vcombine.high %v94_v2, %v98_v3  ;;  %v105_v9 = vld [vmem:[#allocation2 + $0x260] sm:$0xff]  ;;  %v102_v10 = vld [vmem:[#allocation2 + $0x248] sm:$0xff]  ;;  %v1040_v13 = vcombine.low %v94_v2, %v98_v3  ;;  %v35_v2 = vld [vmem:[#allocation2 + $0x30] sm:$0xff] }
  0x26   :  { %v106_v11 = vld [vmem:[#allocation2 + $0x268] sm:$0xff]  ;;  %v1047_v14 = vcombine.high %v101_v8, %v105_v9  ;;  %v109_v16 = vld [vmem:[#allocation2 + $0x280] sm:$0xff]  ;;  %v1046_v20 = vcombine.low %v101_v8, %v105_v9  ;;  %v32_v3 = vld [vmem:[#allocation2 + $0x18] sm:$0xff]  ;;  %v979_v8 = vcombine.high %v31_v1, %v35_v2 }
  0x27   :  { %806 = vmatpush1.bf16.msra.mxu0 %v1006_v42  ;;  %847 = vmatpush1.bf16.msra.mxu1 %v1008_v43  ;;  %v1049_v15 = vcombine.high %v102_v10, %v106_v11  ;;  %v113_v17 = vld [vmem:[#allocation2 + $0x2a0] sm:$0xff]  ;;  %v110_v18 = vld [vmem:[#allocation2 + $0x288] sm:$0xff]  ;;  %v1048_v21 = vcombine.low %v102_v10, %v106_v11  ;;  %v39_v10 = vld [vmem:[#allocation2 + $0x50] sm:$0xff] }
  0x28   :  { %807 = vmatprep.subr.bf16.mxu0 %v1015_v44  ;;  %848 = vmatprep.subr.bf16.mxu1 %v1017_v45  ;;  %v114_v19 = vld [vmem:[#allocation2 + $0x2a8] sm:$0xff]  ;;  %v1055_v22 = vcombine.high %v109_v16, %v113_v17  ;;  %v117_v24 = vld [vmem:[#allocation2 + $0x2c0] sm:$0xff]  ;;  %v1054_v28 = vcombine.low %v109_v16, %v113_v17  ;;  %v43_v11 = vld [vmem:[#allocation2 + $0x70] sm:$0xff] }
  0x29   :  { %v1057_v23 = vcombine.high %v110_v18, %v114_v19  ;;  %v121_v25 = vld [vmem:[#allocation2 + $0x2e0] sm:$0xff]  ;;  %v118_v26 = vld [vmem:[#allocation2 + $0x2c8] sm:$0xff]  ;;  %v1056_v29 = vcombine.low %v110_v18, %v114_v19  ;;  %v987_v17 = vcombine.high %v39_v10, %v43_v11  ;;  %v47_v19 = vld [vmem:[#allocation2 + $0x90] sm:$0xff] }
  0x2a   :  { %v122_v27 = vld [vmem:[#allocation2 + $0x2e8] sm:$0xff]  ;;  %v1063_v30 = vcombine.high %v117_v24, %v121_v25  ;;  %v125_v32 = vld [vmem:[#allocation2 + $0x300] sm:$0xff]  ;;  %v1062_v36 = vcombine.low %v117_v24, %v121_v25 }
  0x2b   :  { %808 = vmatpush1.bf16.msra.mxu0 %v1014_v50  ;;  %849 = vmatpush1.bf16.msra.mxu1 %v1016_v51  ;;  %v1065_v31 = vcombine.high %v118_v26, %v122_v27  ;;  %v129_v33 = vld [vmem:[#allocation2 + $0x320] sm:$0xff]  ;;  %v126_v34 = vld [vmem:[#allocation2 + $0x308] sm:$0xff]  ;;  %v1064_v37 = vcombine.low %v118_v26, %v122_v27  ;;  %v55_v27 = vld [vmem:[#allocation2 + $0xd0] sm:$0xff] }
  0x2c   :  { %809 = vmatprep.subr.bf16.mxu0 %v1023_v52  ;;  %850 = vmatprep.subr.bf16.mxu1 %v1025_v54  ;;  %v130_v35 = vld [vmem:[#allocation2 + $0x328] sm:$0xff]  ;;  %v1071_v38 = vcombine.high %v125_v32, %v129_v33  ;;  %v133_v40 = vld [vmem:[#allocation2 + $0x340] sm:$0xff]  ;;  %v1070_v44 = vcombine.low %v125_v32, %v129_v33 }
  0x2d   :  { %v1073_v39 = vcombine.high %v126_v34, %v130_v35  ;;  %v137_v41 = vld [vmem:[#allocation2 + $0x360] sm:$0xff]  ;;  %v134_v42 = vld [vmem:[#allocation2 + $0x348] sm:$0xff]  ;;  %v1072_v45 = vcombine.low %v126_v34, %v130_v35  ;;  %v63_v35 = vld [vmem:[#allocation2 + $0x110] sm:$0xff] }
  0x2e   :  { %v138_v43 = vld [vmem:[#allocation2 + $0x368] sm:$0xff]  ;;  %v1079_v46 = vcombine.high %v133_v40, %v137_v41  ;;  %v141_v48 = vld [vmem:[#allocation2 + $0x380] sm:$0xff]  ;;  %v1078_v52 = vcombine.low %v133_v40, %v137_v41 }
  0x2f   :  { %810 = vmatpush1.bf16.msra.mxu0 %v1022_v60  ;;  %851 = vmatpush1.bf16.msra.mxu1 %v1024_v61  ;;  %v1081_v47 = vcombine.high %v134_v42, %v138_v43  ;;  %v145_v49 = vld [vmem:[#allocation2 + $0x3a0] sm:$0xff]  ;;  %v142_v50 = vld [vmem:[#allocation2 + $0x388] sm:$0xff]  ;;  %v1080_v53 = vcombine.low %v134_v42, %v138_v43  ;;  %v71_v42 = vld [vmem:[#allocation2 + $0x150] sm:$0xff] }
  0x30   :  { %811 = vmatprep.subr.bf16.mxu0 %v1031_v62  ;;  %852 = vmatprep.subr.bf16.mxu1 %v1033_v63  ;;  %v146_v51 = vld [vmem:[#allocation2 + $0x3a8] sm:$0xff]  ;;  %v1087_v54 = vcombine.high %v141_v48, %v145_v49  ;;  %v149_v56 = vld [vmem:[#allocation2 + $0x3c0] sm:$0xff]  ;;  %v1086_v61 = vcombine.low %v141_v48, %v145_v49  ;;  %v75_v43 = vld [vmem:[#allocation2 + $0x170] sm:$0xff] }
  0x31   :  { %v1089_v55 = vcombine.high %v142_v50, %v146_v51  ;;  %v153_v58 = vld [vmem:[#allocation2 + $0x3e0] sm:$0xff]  ;;  %v150_v59 = vld [vmem:[#allocation2 + $0x3c8] sm:$0xff]  ;;  %v1088_v62 = vcombine.low %v142_v50, %v146_v51  ;;  %v1019_v48 = vcombine.high %v71_v42, %v75_v43  ;;  %v79_v50 = vld [vmem:[#allocation2 + $0x190] sm:$0xff] }
  0x32   :  { %v154_v60 = vld [vmem:[#allocation2 + $0x3e8] sm:$0xff]  ;;  %v1095_v63 = vcombine.high %v149_v56, %v153_v58  ;;  %v83_v51 = vld [vmem:[#allocation2 + $0x1b0] sm:$0xff] }
  0x33   :  { %812 = vmatpush1.bf16.msra.mxu0 %v1030_v4  ;;  %853 = vmatpush1.bf16.msra.mxu1 %v1032_v5  ;;  %v1097_v0 = vcombine.high %v150_v59, %v154_v60  ;;  %v36_v4 = vld [vmem:[#allocation2 + $0x38] sm:$0xff]  ;;  %v1094_v5 = vcombine.low %v149_v56, %v153_v58  ;;  %v1027_v56 = vcombine.high %v79_v50, %v83_v51 }
  0x34   :  { %813 = vmatprep.subr.bf16.mxu0 %v1039_v6  ;;  %854 = vmatprep.subr.bf16.mxu1 %v1041_v7  ;;  %v25_v6 = vld [vmem:[%s1202_s1] sm:$0xff]  ;;  %v1096_v7 = vcombine.low %v150_v59, %v154_v60  ;;  %v981_v9 = vcombine.high %v32_v3, %v36_v4  ;;  %v980_v16 = vcombine.low %v32_v3, %v36_v4  ;;  %v87_v59 = vld [vmem:[#allocation2 + $0x1d0] sm:$0xff] }
  0x35   :  { %v91_v60 = vld [vmem:[#allocation2 + $0x1f0] sm:$0xff] }
  0x36   :  { %v95_v3 = vld [vmem:[#allocation2 + $0x210] sm:$0xff] }
  0x37   :  { %814 = vmatpush1.bf16.msra.mxu0 %v1038_v12  ;;  %855 = vmatpush1.bf16.msra.mxu1 %v1040_v13  ;;  %v1169_v12 = vpack.c.bf16 %v25_v6, %v25_v6  ;;  %v40_v13 = vld [vmem:[#allocation2 + $0x58] sm:$0xff]  ;;  %v99_v4 = vld [vmem:[#allocation2 + $0x230] sm:$0xff] }
  0x38   :  { %815 = vmatprep.subr.bf16.mxu0 %v1047_v14  ;;  %856 = vmatprep.subr.bf16.mxu1 %v1049_v15  ;;  %v44_v14 = vld [vmem:[#allocation2 + $0x78] sm:$0xff]  ;;  %v978_v15 = vcombine.low %v31_v1, %v35_v2  ;;  %v1035_v1 = vcombine.high %v87_v59, %v91_v60 }
  0x39   :  { %v989_v18 = vcombine.high %v40_v13, %v44_v14  ;;  %v988_v24 = vcombine.low %v40_v13, %v44_v14  ;;  %v100_v6 = vld [vmem:[#allocation2 + $0x238] sm:$0xff]  ;;  %v107_v13 = vld [vmem:[#allocation2 + $0x270] sm:$0xff] }
  0x3a   :  { %v104_v14 = vld [vmem:[#allocation2 + $0x258] sm:$0xff] }
  0x3b   :  { %816 = vmatpush1.bf16.msra.mxu0 %v1046_v20  ;;  %857 = vmatpush1.bf16.msra.mxu1 %v1048_v21  ;;  %v51_v20 = vld [vmem:[#allocation2 + $0xb0] sm:$0xff]  ;;  %v48_v21 = vld [vmem:[#allocation2 + $0x98] sm:$0xff] }
  0x3c   :  { %817 = vmatprep.subr.bf16.mxu0 %v1055_v22  ;;  %858 = vmatprep.subr.bf16.mxu1 %v1057_v23  ;;  %v52_v22 = vld [vmem:[#allocation2 + $0xb8] sm:$0xff]  ;;  %v986_v23 = vcombine.low %v39_v10, %v43_v11  ;;  %v995_v25 = vcombine.high %v47_v19, %v51_v20  ;;  %v103_v11 = vld [vmem:[#allocation2 + $0x250] sm:$0xff] }
  0x3d   :  { %v997_v26 = vcombine.high %v48_v21, %v52_v22  ;;  %v996_v32 = vcombine.low %v48_v21, %v52_v22  ;;  %v115_v21 = vld [vmem:[#allocation2 + $0x2b0] sm:$0xff]  ;;  %v112_v22 = vld [vmem:[#allocation2 + $0x298] sm:$0xff] }
  0x3f   :  { %818 = vmatpush1.bf16.msra.mxu0 %v1054_v28  ;;  %859 = vmatpush1.bf16.msra.mxu1 %v1056_v29  ;;  %v59_v28 = vld [vmem:[#allocation2 + $0xf0] sm:$0xff]  ;;  %v56_v29 = vld [vmem:[#allocation2 + $0xd8] sm:$0xff] }
  0x40   :  { %819 = vmatprep.subr.bf16.mxu0 %v1063_v30  ;;  %860 = vmatprep.subr.bf16.mxu1 %v1065_v31  ;;  %v60_v30 = vld [vmem:[#allocation2 + $0xf8] sm:$0xff]  ;;  %v994_v31 = vcombine.low %v47_v19, %v51_v20  ;;  %v1003_v33 = vcombine.high %v55_v27, %v59_v28  ;;  %v111_v20 = vld [vmem:[#allocation2 + $0x290] sm:$0xff] }
  0x41   :  { %v1005_v34 = vcombine.high %v56_v29, %v60_v30  ;;  %v1004_v40 = vcombine.low %v56_v29, %v60_v30  ;;  %v123_v29 = vld [vmem:[#allocation2 + $0x2f0] sm:$0xff]  ;;  %v120_v30 = vld [vmem:[#allocation2 + $0x2d8] sm:$0xff] }
  0x43   :  { %820 = vmatpush1.bf16.msra.mxu0 %v1062_v36  ;;  %861 = vmatpush1.bf16.msra.mxu1 %v1064_v37  ;;  %v67_v36 = vld [vmem:[#allocation2 + $0x130] sm:$0xff]  ;;  %v64_v37 = vld [vmem:[#allocation2 + $0x118] sm:$0xff] }
  0x44   :  { %821 = vmatprep.subr.bf16.mxu0 %v1071_v38  ;;  %862 = vmatprep.subr.bf16.mxu1 %v1073_v39  ;;  %v68_v38 = vld [vmem:[#allocation2 + $0x138] sm:$0xff]  ;;  %v1002_v39 = vcombine.low %v55_v27, %v59_v28  ;;  %v1011_v41 = vcombine.high %v63_v35, %v67_v36  ;;  %v119_v28 = vld [vmem:[#allocation2 + $0x2d0] sm:$0xff] }
  0x47   :  { %822 = vmatpush1.bf16.msra.mxu0 %v1070_v44  ;;  %863 = vmatpush1.bf16.msra.mxu1 %v1072_v45  ;;  %v72_v44 = vld [vmem:[#allocation2 + $0x158] sm:$0xff] }
  0x48   :  { %823 = vmatprep.subr.bf16.mxu0 %v1079_v46  ;;  %864 = vmatprep.subr.bf16.mxu1 %v1081_v47  ;;  %v76_v45 = vld [vmem:[#allocation2 + $0x178] sm:$0xff]  ;;  %v1010_v46 = vcombine.low %v63_v35, %v67_v36  ;;  %v1012_v47 = vcombine.low %v64_v37, %v68_v38  ;;  %v127_v36 = vld [vmem:[#allocation2 + $0x310] sm:$0xff] }
  0x49   :  { %v1021_v49 = vcombine.high %v72_v44, %v76_v45 }
  0x4b   :  { %824 = vmatpush1.bf16.msra.mxu0 %v1078_v52  ;;  %865 = vmatpush1.bf16.msra.mxu1 %v1080_v53  ;;  %v80_v52 = vld [vmem:[#allocation2 + $0x198] sm:$0xff] }
  0x4c   :  { %825 = vmatprep.subr.bf16.mxu0 %v1087_v54  ;;  %866 = vmatprep.subr.bf16.mxu1 %v1089_v55  ;;  %v84_v53 = vld [vmem:[#allocation2 + $0x1b8] sm:$0xff]  ;;  %v1018_v54 = vcombine.low %v71_v42, %v75_v43  ;;  %v1020_v55 = vcombine.low %v72_v44, %v76_v45  ;;  %v135_v43 = vld [vmem:[#allocation2 + $0x350] sm:$0xff] }
  0x4d   :  { %v1029_v58 = vcombine.high %v80_v52, %v84_v53  ;;  %v139_v44 = vld [vmem:[#allocation2 + $0x370] sm:$0xff]  ;;  %v136_v45 = vld [vmem:[#allocation2 + $0x358] sm:$0xff] }
  0x4f   :  { %826 = vmatpush1.bf16.msra.mxu0 %v1086_v61  ;;  %867 = vmatpush1.bf16.msra.mxu1 %v1088_v62  ;;  %v88_v61 = vld [vmem:[#allocation2 + $0x1d8] sm:$0xff] }
  0x50   :  { %827 = vmatprep.subr.bf16.mxu0 %v1095_v63  ;;  %868 = vmatprep.subr.bf16.mxu1 %v1097_v0  ;;  %v92_v62 = vld [vmem:[#allocation2 + $0x1f8] sm:$0xff]  ;;  %v1026_v63 = vcombine.low %v79_v50, %v83_v51  ;;  %v1028_v0 = vcombine.low %v80_v52, %v84_v53  ;;  %v143_v51 = vld [vmem:[#allocation2 + $0x390] sm:$0xff] }
  0x51   :  { %v1037_v2 = vcombine.high %v88_v61, %v92_v62  ;;  %v147_v52 = vld [vmem:[#allocation2 + $0x3b0] sm:$0xff]  ;;  %v144_v53 = vld [vmem:[#allocation2 + $0x398] sm:$0xff] }
  0x53   :  { %828 = vmatpush1.bf16.msra.mxu0 %v1094_v5  ;;  %869 = vmatpush1.bf16.msra.mxu1 %v1096_v7  ;;  %v96_v5 = vld [vmem:[#allocation2 + $0x218] sm:$0xff]  ;;  %v1034_v7 = vcombine.low %v87_v59, %v91_v60  ;;  %v151_v60 = vld [vmem:[#allocation2 + $0x3d0] sm:$0xff] }
  0x54   :  { %879 = vmatprep.subr.bf16.mxu0 %v979_v8  ;;  %920 = vmatprep.subr.bf16.mxu1 %v981_v9  ;;  %v1036_v8 = vcombine.low %v88_v61, %v92_v62  ;;  %v1043_v9 = vcombine.high %v95_v3, %v99_v4  ;;  %v1045_v10 = vcombine.high %v96_v5, %v100_v6  ;;  %v155_v61 = vld [vmem:[#allocation2 + $0x3f0] sm:$0xff]  ;;  %v152_v62 = vld [vmem:[#allocation2 + $0x3d8] sm:$0xff] }
  0x56   :  { %830 = vmatmul.mubr.bf16.vlgmr.msra.gmra.mrb[0].mxu0 %v1169_v12  ;;  %871 = vmatmul.mubr.bf16.vlgmr.msra.gmra.mrb[0].mxu1 %v1169_v12 }
  0x57   :  { %880 = vmatpush1.bf16.msra.mxu0 %v978_v15  ;;  %921 = vmatpush1.bf16.msra.mxu1 %v980_v16  ;;  %v108_v15 = vld [vmem:[#allocation2 + $0x278] sm:$0xff]  ;;  %v1042_v16 = vcombine.low %v95_v3, %v99_v4  ;;  %v1098_v4 = vcombine.low %v151_v60, %v155_v61 }
  0x58   :  { %881 = vmatprep.subr.bf16.mxu0 %v987_v17  ;;  %922 = vmatprep.subr.bf16.mxu1 %v989_v18  ;;  %v1044_v17 = vcombine.low %v96_v5, %v100_v6  ;;  %v1051_v18 = vcombine.high %v103_v11, %v107_v13  ;;  %v1053_v19 = vcombine.high %v104_v14, %v108_v15 }
  0x59   :  { %911 = vmatprep.mubr.bf16.mxu0 %v1162_v57  ;;  %952 = vmatprep.mubr.bf16.mxu1 %v1162_v57  ;;  %v1013_v57 = vcombine.high %v64_v37, %v68_v38  ;;  %v131_v37 = vld [vmem:[#allocation2 + $0x330] sm:$0xff]  ;;  %v128_v38 = vld [vmem:[#allocation2 + $0x318] sm:$0xff] }
  0x5b   :  { %882 = vmatpush1.bf16.msra.mxu0 %v986_v23  ;;  %923 = vmatpush1.bf16.msra.mxu1 %v988_v24  ;;  %v116_v23 = vld [vmem:[#allocation2 + $0x2b8] sm:$0xff]  ;;  %v1050_v24 = vcombine.low %v103_v11, %v107_v13 }
  0x5c   :  { %883 = vmatprep.subr.bf16.mxu0 %v995_v25  ;;  %924 = vmatprep.subr.bf16.mxu1 %v997_v26  ;;  %v1052_v25 = vcombine.low %v104_v14, %v108_v15  ;;  %v1059_v26 = vcombine.high %v111_v20, %v115_v21  ;;  %v1061_v27 = vcombine.high %v112_v22, %v116_v23 }
  0x5f   :  { %884 = vmatpush1.bf16.msra.mxu0 %v994_v31  ;;  %925 = vmatpush1.bf16.msra.mxu1 %v996_v32  ;;  %v124_v31 = vld [vmem:[#allocation2 + $0x2f8] sm:$0xff]  ;;  %v1058_v32 = vcombine.low %v111_v20, %v115_v21 }
  0x60   :  { %885 = vmatprep.subr.bf16.mxu0 %v1003_v33  ;;  %926 = vmatprep.subr.bf16.mxu1 %v1005_v34  ;;  %v1060_v33 = vcombine.low %v112_v22, %v116_v23  ;;  %v1067_v34 = vcombine.high %v119_v28, %v123_v29  ;;  %v1069_v35 = vcombine.high %v120_v30, %v124_v31 }
  0x63   :  { %886 = vmatpush1.bf16.msra.mxu0 %v1002_v39  ;;  %927 = vmatpush1.bf16.msra.mxu1 %v1004_v40  ;;  %v132_v39 = vld [vmem:[#allocation2 + $0x338] sm:$0xff]  ;;  %v1066_v40 = vcombine.low %v119_v28, %v123_v29 }
  0x64   :  { %887 = vmatprep.subr.bf16.mxu0 %v1011_v41  ;;  %928 = vmatprep.subr.bf16.mxu1 %v1013_v57  ;;  %v1068_v41 = vcombine.low %v120_v30, %v124_v31  ;;  %v1075_v57 = vcombine.high %v127_v36, %v131_v37  ;;  %v1077_v42 = vcombine.high %v128_v38, %v132_v39 }
  0x67   :  { %888 = vmatpush1.bf16.msra.mxu0 %v1010_v46  ;;  %929 = vmatpush1.bf16.msra.mxu1 %v1012_v47  ;;  %v140_v46 = vld [vmem:[#allocation2 + $0x378] sm:$0xff]  ;;  %v1074_v47 = vcombine.low %v127_v36, %v131_v37 }
  0x68   :  { %889 = vmatprep.subr.bf16.mxu0 %v1019_v48  ;;  %930 = vmatprep.subr.bf16.mxu1 %v1021_v49  ;;  %v1076_v48 = vcombine.low %v128_v38, %v132_v39  ;;  %v1083_v49 = vcombine.high %v135_v43, %v139_v44  ;;  %v1085_v50 = vcombine.high %v136_v45, %v140_v46 }
  0x6b   :  { %890 = vmatpush1.bf16.msra.mxu0 %v1018_v54  ;;  %931 = vmatpush1.bf16.msra.mxu1 %v1020_v55  ;;  %v148_v54 = vld [vmem:[#allocation2 + $0x3b8] sm:$0xff]  ;;  %v1082_v55 = vcombine.low %v135_v43, %v139_v44 }
  0x6c   :  { %891 = vmatprep.subr.bf16.mxu0 %v1027_v56  ;;  %932 = vmatprep.subr.bf16.mxu1 %v1029_v58  ;;  %v1084_v56 = vcombine.low %v136_v45, %v140_v46  ;;  %v1091_v58 = vcombine.high %v143_v51, %v147_v52  ;;  %v1093_v59 = vcombine.high %v144_v53, %v148_v54 }
  0x6f   :  { %892 = vmatpush1.bf16.msra.mxu0 %v1026_v63  ;;  %933 = vmatpush1.bf16.msra.mxu1 %v1028_v0  ;;  %v156_v63 = vld [vmem:[#allocation2 + $0x3f8] sm:$0xff]  ;;  %v1090_v0 = vcombine.low %v143_v51, %v147_v52 }
  0x70   :  { %893 = vmatprep.subr.bf16.mxu0 %v1035_v1  ;;  %934 = vmatprep.subr.bf16.mxu1 %v1037_v2  ;;  %v1092_v1 = vcombine.low %v144_v53, %v148_v54  ;;  %v1099_v2 = vcombine.high %v151_v60, %v155_v61  ;;  %v1101_v3 = vcombine.high %v152_v62, %v156_v63 }
  0x71   :  { %v1100_v5 = vcombine.low %v152_v62, %v156_v63 }
  0x73   :  { %894 = vmatpush1.bf16.msra.mxu0 %v1034_v7  ;;  %935 = vmatpush1.bf16.msra.mxu1 %v1036_v8 }
  0x74   :  { %895 = vmatprep.subr.bf16.mxu0 %v1043_v9  ;;  %936 = vmatprep.subr.bf16.mxu1 %v1045_v10 }
  0x77   :  { %896 = vmatpush1.bf16.msra.mxu0 %v1042_v16  ;;  %937 = vmatpush1.bf16.msra.mxu1 %v1044_v17 }
  0x78   :  { %897 = vmatprep.subr.bf16.mxu0 %v1051_v18  ;;  %938 = vmatprep.subr.bf16.mxu1 %v1053_v19 }
  0x7b   :  { %898 = vmatpush1.bf16.msra.mxu0 %v1050_v24  ;;  %939 = vmatpush1.bf16.msra.mxu1 %v1052_v25 }
  0x7c   :  { %899 = vmatprep.subr.bf16.mxu0 %v1059_v26  ;;  %940 = vmatprep.subr.bf16.mxu1 %v1061_v27 }
  0x7f   :  { %900 = vmatpush1.bf16.msra.mxu0 %v1058_v32  ;;  %941 = vmatpush1.bf16.msra.mxu1 %v1060_v33 }
  0x80   :  { %901 = vmatprep.subr.bf16.mxu0 %v1067_v34  ;;  %942 = vmatprep.subr.bf16.mxu1 %v1069_v35 }
  0x83   :  { %902 = vmatpush1.bf16.msra.mxu0 %v1066_v40  ;;  %943 = vmatpush1.bf16.msra.mxu1 %v1068_v41 }
  0x84   :  { %903 = vmatprep.subr.bf16.mxu0 %v1075_v57  ;;  %944 = vmatprep.subr.bf16.mxu1 %v1077_v42 }
  0x87   :  { %904 = vmatpush1.bf16.msra.mxu0 %v1074_v47  ;;  %945 = vmatpush1.bf16.msra.mxu1 %v1076_v48 }
  0x88   :  { %905 = vmatprep.subr.bf16.mxu0 %v1083_v49  ;;  %946 = vmatprep.subr.bf16.mxu1 %v1085_v50 }
  0x8b   :  { %906 = vmatpush1.bf16.msra.mxu0 %v1082_v55  ;;  %947 = vmatpush1.bf16.msra.mxu1 %v1084_v56 }
  0x8c   :  { %907 = vmatprep.subr.bf16.mxu0 %v1091_v58  ;;  %948 = vmatprep.subr.bf16.mxu1 %v1093_v59 }
  0x8f   :  { %908 = vmatpush1.bf16.msra.mxu0 %v1090_v0  ;;  %949 = vmatpush1.bf16.msra.mxu1 %v1092_v1 }
  0x90   :  { %909 = vmatprep.subr.bf16.mxu0 %v1099_v2  ;;  %950 = vmatprep.subr.bf16.mxu1 %v1101_v3 }
  0x93   :  { %910 = vmatpush1.bf16.msra.mxu0 %v1098_v4  ;;  %951 = vmatpush1.bf16.msra.mxu1 %v1100_v5 }
  0x96   :  { %912 = vmatmul.mubr.bf16.vlgmr.msra.gmra.mrb[4].mxu0 %v1169_v12  ;;  %953 = vmatmul.mubr.bf16.vlgmr.msra.gmra.mrb[4].mxu1 %v1169_v12 }
 0x129   :  { %v831_v6 = vpop.f32.mrb[0].mxu0  ;;  %v872_v7 = vpop.f32.mrb[0].mxu1 }
 0x12a   :  { %961 = vst [vmem:[%s1203_s2] sm:$0xff] %v831_v6  ;;  %v833_v8 = vpop.f32.mrb[1].mxu0  ;;  %963 = vst [vmem:[%s1203_s2 + $0x10] sm:$0xff] %v872_v7  ;;  %v874_v9 = vpop.f32.mrb[1].mxu1 }
 0x12b   :  { %962 = vst [vmem:[%s1203_s2 + $0x8] sm:$0xff] %v833_v8  ;;  %v835_v10 = vpop.f32.mrb[2].mxu0  ;;  %964 = vst [vmem:[%s1203_s2 + $0x18] sm:$0xff] %v874_v9  ;;  %v876_v12 = vpop.f32.mrb[2].mxu1 }
 0x12c   :  { %v836_v11 = vpop.f32.mrb[3].mxu0  ;;  %v877_v13 = vpop.f32.mrb[3].mxu1 }
 0x169   :  { %v913_v14 = vpop.f32.mrb[4].mxu0  ;;  %v954_v15 = vpop.f32.mrb[4].mxu1 }
 0x16a   :  { %965 = vst [vmem:[%s1203_s2 + $0x20] sm:$0xff] %v913_v14  ;;  %v915_v16 = vpop.f32.mrb[5].mxu0  ;;  %967 = vst [vmem:[%s1203_s2 + $0x30] sm:$0xff] %v954_v15  ;;  %v956_v17 = vpop.f32.mrb[5].mxu1 }
 0x16b   :  { %966 = vst [vmem:[%s1203_s2 + $0x28] sm:$0xff] %v915_v16  ;;  %v917_v18 = vpop.f32.mrb[6].mxu0  ;;  %968 = vst [vmem:[%s1203_s2 + $0x38] sm:$0xff] %v956_v17  ;;  %v958_v19 = vpop.f32.mrb[6].mxu1 }
 0x16c   :  { %v918_v20 = vpop.f32.mrb[7].mxu0  ;;  %v959_v21 = vpop.f32.mrb[7].mxu1 }
 0x16d   :  { %973 = vsyncpa [#allocation3], 1 }

</bundles_post_ra>
